<compile_context>
chip_gen: v7x
topology: tpu7x:2x2x1
jax: 0.10.0
libtpu: 0.0.40
codegen_flags: <defaults>
</compile_context>

<pallas_src>
import jax
import jax.numpy as jnp
from jax.experimental import pallas as pl
from jax.experimental.pallas import tpu as pltpu


def self_attention_kernel(x_ref, W_ref, bW_ref, uw_ref, out_ref):
    # x_ref block: (TB, S, D) — a tile of batch rows (full S and D).
    xb = x_ref[...]                                              # (TB, S, D)
    TB, S, D = xb.shape
    H = W_ref.shape[1]

    # u = tanh(x @ W + bW): flatten (TB, S) into M so one MXU matmul covers the
    # whole tile.  (Layout-free reshape when S is a multiple of 8.)
    x2 = xb.reshape(TB * S, D)
    u = jnp.tanh(
        jnp.dot(x2, W_ref[...], preferred_element_type=jnp.float32)
        + bW_ref[...]
    )                                                            # (TB*S, H) f32

    # Scores: VPU multiply + XLU lane reduce instead of an N=1 MXU matmul; the
    # sequence axis ends up on lanes so softmax runs on dense vregs.
    # (u-layer bias omitted: softmax over the sequence is shift-invariant.)
    s = jnp.sum((u * uw_ref[...]).reshape(TB, S, H), axis=-1)    # (TB, S)

    # Numerically stable softmax over the sequence axis; normalization is
    # folded into the final (TB, D) result (one fewer (TB, S) multiply).
    s = s - jnp.max(s, axis=-1, keepdims=True)
    e = jnp.exp(s)                                               # (TB, S)
    inv_l = pl.reciprocal(jnp.sum(e, axis=-1, keepdims=True), approx=True)

    # out[t, d] = (sum_s e[t, s] * x[t, s, d]) / l[t]
    # Broadcast-multiply + sublane reduce; the (TB, S, D) f32 temporary is
    # accounted for in _plan_tiles, and the VALU cost (~2 ops/elem) is well
    # below the HBM roofline, so this stays off the MXU.
    wsum = jnp.sum(e[:, :, None] * xb, axis=1)                   # (TB, D)
    out_ref[...] = (wsum * inv_l).astype(out_ref.dtype)


def _vmem_capacity_bytes():
    """Physical per-core VMEM; conservative (v7x-sized) fallback off-device."""
    try:
        info = pltpu.get_tpu_info()
        cap = int(getattr(info, "vmem_capacity_bytes", 0))
        if cap > 0:
            return cap
    except Exception:
        pass
    return 64 * 1024 * 1024


def _plan_tiles(B, S, D, H, itemsize):
    """Pick (TB, Bp, vmem_cap): batch-tile rows, padded batch, VMEM capacity.

    Per-batch-row VMEM high-water model (lane-padded to the (8,128) layout):
      * x input block, double-buffered by the pipeline:  2 * Sp * Dp * itemsize
      * f32 intermediates: x value copy + weighted-sum temp (2 * Sp * Dp),
        matmul accumulator + tanh(u) + score temps (3 * S * Hp),
        output row (Dp):                                  4 * (...)
    """
    Dp = pl.cdiv(D, 128) * 128
    Hp = pl.cdiv(H, 128) * 128
    Sp = pl.cdiv(S, 8) * 8

    vmem_cap = _vmem_capacity_bytes()
    budget = int(vmem_cap * 0.45)      # headroom: weights, Mosaic scratch, etc.
    row_bytes = (2 * Sp * Dp * itemsize
                 + 4 * (2 * Sp * Dp + 3 * S * Hp + Dp))

    cap = budget // max(row_bytes, 1)
    cap = min(cap, 4096)               # per-step DMA plateaus ~1-2 MiB; bound
                                       # value sizes / compile time
    cap = max(8, (cap // 8) * 8)

    if B < 16:
        # Tiny batch: one grid step; block == full array (no (8,128) constraint
        # on the leading dim, no padding needed).
        return B, B, vmem_cap

    # Keep >= 2 grid steps so the "parallel" batch axis can shard across v7x's
    # two TensorCores (one extra ~0.35 us step is cheap on v5e/v6e).
    half = pl.cdiv(pl.cdiv(B, 2), 8) * 8
    TB = max(8, min(cap, half))
    Bp = pl.cdiv(B, TB) * TB
    return TB, Bp, vmem_cap


def self_attention(x, W, bW, u_w, u_b=None):
    B, S, D = x.shape
    H = W.shape[1]
    bW2 = bW.reshape(1, H)
    uw_row = u_w.reshape(1, H)        # (H, 1) column -> (1, H) row for VPU use
    # u_b is intentionally not passed to the kernel (softmax shift-invariance).

    TB, Bp, vmem_cap = _plan_tiles(B, S, D, H, x.dtype.itemsize)
    if Bp != B:
        # Zero-padded rows produce finite garbage that is sliced away below.
        x = jnp.pad(x, ((0, Bp - B), (0, 0), (0, 0)))

    out = pl.pallas_call(
        self_attention_kernel,
        out_shape=jax.ShapeDtypeStruct((Bp, D), x.dtype),
        grid_spec=pltpu.PrefetchScalarGridSpec(
            num_scalar_prefetch=0,
            grid=(Bp // TB,),
            in_specs=[
                pl.BlockSpec((TB, S, D), lambda b: (b, 0, 0)),   # x batch tile
                pl.BlockSpec((D, H), lambda b: (0, 0)),          # W (constant)
                pl.BlockSpec((1, H), lambda b: (0, 0)),          # bW (constant)
                pl.BlockSpec((1, H), lambda b: (0, 0)),          # u weight row
            ],
            out_specs=pl.BlockSpec((TB, D), lambda b: (b, 0)),
        ),
        compiler_params=pltpu.CompilerParams(
            dimension_semantics=("parallel",),
            # Raise the scoped-VMEM limit so the generation-aware tiles fit
            # (~96 MiB on v5e/v6e's 128 MiB, ~48 MiB on v7x's 64 MiB).
            vmem_limit_bytes=int(vmem_cap * 3 // 4),
        ),
    )(x, W, bW2, uw_row)
    return out[:B]


def self_attention_ref(x, W, bW, u_w, u_b):
    u = jnp.tanh(jnp.einsum("bsd,dh->bsh", x, W) + bW)
    s = jnp.einsum("bsh,ho->bso", u, u_w) + u_b
    a = jax.nn.softmax(s, axis=1)
    return jnp.sum(a * x, axis=1)


if __name__ == "__main__":
    B, S, D, H = 2, 8, 32, 32  # batch, seq, input_size, hidden_size

    key = jax.random.PRNGKey(0)
    kx, kW, kbW, kuw, kub = jax.random.split(key, 5)

    x = jax.random.normal(kx, (B, S, D), dtype=jnp.float32)
    # Deterministic synthetic parameters (shapes from nn.Linear(D, H) / nn.Linear(H, 1)).
    W = jax.random.normal(kW, (D, H), dtype=jnp.float32) * 0.1
    bW = jax.random.normal(kbW, (H,), dtype=jnp.float32) * 0.1
    u_w = jax.random.normal(kuw, (H, 1), dtype=jnp.float32) * 0.1
    u_b = jax.random.normal(kub, (1,), dtype=jnp.float32) * 0.1

    out = self_attention(x, W, bW, u_w, u_b)
    out = jax.block_until_ready(out)

    ref = self_attention_ref(x, W, bW, u_w, u_b)
    assert out.shape == (B, D)
    # Tolerance loosened slightly for the EUP approximate reciprocal in softmax.
    assert jnp.allclose(out, ref, atol=2e-3, rtol=2e-3), "mismatch vs reference"

    print("KERNEL_OK")
</pallas_src>

<mosaic_0001>
module attributes {stable_mosaic.version = 11 : i64} {
  func.func @self_attention_kernel(%arg0: i32, %arg1: memref<2x8x32xf32, #tpu.memory_space<vmem>>, %arg2: memref<32x32xf32, #tpu.memory_space<vmem>>, %arg3: memref<1x32xf32, #tpu.memory_space<vmem>>, %arg4: memref<1x32xf32, #tpu.memory_space<vmem>>, %arg5: memref<2x32xf32, #tpu.memory_space<vmem>>) attributes {dimension_semantics = [#tpu.dimension_semantics<parallel>], iteration_bounds = array<i64: 1>, scalar_prefetch = 0 : i64, scratch_operands = 0 : i64, tpu.core_type = #tpu.core_type<tc>, window_params = [{transform_indices = @transform_0, window_bounds = array<i64: 2, 8, 32>}, {pipeline_mode = #tpu.pipeline_mode<synchronous>, transform_indices = @transform_1, window_bounds = array<i64: 32, 32>}, {pipeline_mode = #tpu.pipeline_mode<synchronous>, transform_indices = @transform_2, window_bounds = array<i64: 1, 32>}, {pipeline_mode = #tpu.pipeline_mode<synchronous>, transform_indices = @transform_3, window_bounds = array<i64: 1, 32>}, {transform_indices = @transform_4, window_bounds = array<i64: 2, 32>}]} {
    %c0 = arith.constant 0 : index
    %c0_0 = arith.constant 0 : index
    %c0_1 = arith.constant 0 : index
    %0 = vector.load %arg1[%c0, %c0_0, %c0_1] : memref<2x8x32xf32, #tpu.memory_space<vmem>>, vector<2x8x32xf32>
    %1 = vector.shape_cast %0 : vector<2x8x32xf32> to vector<16x32xf32>
    %c0_2 = arith.constant 0 : index
    %c0_3 = arith.constant 0 : index
    %2 = vector.load %arg2[%c0_2, %c0_3] : memref<32x32xf32, #tpu.memory_space<vmem>>, vector<32x32xf32>
    %cst = arith.constant dense<0.000000e+00> : vector<16x32xf32>
    %3 = tpu.matmul %1, %2, %cst {dimension_numbers = #tpu.dot_dimension_numbers<[1], [0], [0], [1], [0, 0, 1, 1], [], []>} : vector<16x32xf32>, vector<32x32xf32>, vector<16x32xf32> -> vector<16x32xf32>
    %c0_4 = arith.constant 0 : index
    %c0_5 = arith.constant 0 : index
    %4 = vector.load %arg3[%c0_4, %c0_5] : memref<1x32xf32, #tpu.memory_space<vmem>>, vector<1x32xf32>
    %5 = vector.broadcast %4 : vector<1x32xf32> to vector<16x32xf32>
    %6 = arith.addf %3, %5 : vector<16x32xf32>
    %7 = math.tanh %6 : vector<16x32xf32>
    %c0_6 = arith.constant 0 : index
    %c0_7 = arith.constant 0 : index
    %8 = vector.load %arg4[%c0_6, %c0_7] : memref<1x32xf32, #tpu.memory_space<vmem>>, vector<1x32xf32>
    %9 = vector.broadcast %8 : vector<1x32xf32> to vector<16x32xf32>
    %10 = arith.mulf %7, %9 : vector<16x32xf32>
    %11 = vector.shape_cast %10 : vector<16x32xf32> to vector<2x8x32xf32>
    %cst_8 = arith.constant dense<0.000000e+00> : vector<2x8xf32>
    %12 = vector.multi_reduction <add>, %11, %cst_8 [2] : vector<2x8x32xf32> to vector<2x8xf32>
    %cst_9 = arith.constant dense<0xFF800000> : vector<2xf32>
    %13 = vector.multi_reduction <maximumf>, %12, %cst_9 [1] : vector<2x8xf32> to vector<2xf32>
    %14 = vector.shape_cast %13 : vector<2xf32> to vector<2x1xf32>
    %15 = vector.broadcast %14 : vector<2x1xf32> to vector<2x8xf32>
    %16 = arith.subf %12, %15 : vector<2x8xf32>
    %17 = math.exp %16 : vector<2x8xf32>
    %cst_10 = arith.constant dense<0.000000e+00> : vector<2xf32>
    %18 = vector.multi_reduction <add>, %17, %cst_10 [1] : vector<2x8xf32> to vector<2xf32>
    %19 = vector.shape_cast %18 : vector<2xf32> to vector<2x1xf32>
    %20 = tpu.reciprocal %19 {approx = true} : vector<2x1xf32> -> vector<2x1xf32>
    %21 = vector.shape_cast %17 : vector<2x8xf32> to vector<2x8x1xf32>
    %22 = vector.broadcast %21 : vector<2x8x1xf32> to vector<2x8x32xf32>
    %23 = arith.mulf %22, %0 : vector<2x8x32xf32>
    %cst_11 = arith.constant dense<0.000000e+00> : vector<2x32xf32>
    %24 = vector.multi_reduction <add>, %23, %cst_11 [1] : vector<2x8x32xf32> to vector<2x32xf32>
    %25 = vector.broadcast %20 : vector<2x1xf32> to vector<2x32xf32>
    %26 = arith.mulf %24, %25 : vector<2x32xf32>
    %c0_12 = arith.constant 0 : index
    %c0_13 = arith.constant 0 : index
    %27 = vector.load %arg5[%c0_12, %c0_13] : memref<2x32xf32, #tpu.memory_space<vmem>>, vector<2x32xf32>
    tpu.vector_store %arg5[%c0_12, %c0_13], %26 {strides = array<i32>} : memref<2x32xf32, #tpu.memory_space<vmem>>, vector<2x32xf32>,
    return
  }
  func.func @transform_0(%arg0: i32) -> (i32, i32, i32) {
    %c0_i32 = arith.constant 0 : i32
    %c0_i32_0 = arith.constant 0 : i32
    %c0_i32_1 = arith.constant 0 : i32
    return %arg0, %c0_i32, %c0_i32_0 : i32, i32, i32
  }
  func.func @transform_1(%arg0: i32) -> (i32, i32) {
    %c0_i32 = arith.constant 0 : i32
    %c0_i32_0 = arith.constant 0 : i32
    %c0_i32_1 = arith.constant 0 : i32
    return %c0_i32, %c0_i32_0 : i32, i32
  }
  func.func @transform_2(%arg0: i32) -> (i32, i32) {
    %c0_i32 = arith.constant 0 : i32
    %c0_i32_0 = arith.constant 0 : i32
    %c0_i32_1 = arith.constant 0 : i32
    return %c0_i32, %c0_i32_0 : i32, i32
  }
  func.func @transform_3(%arg0: i32) -> (i32, i32) {
    %c0_i32 = arith.constant 0 : i32
    %c0_i32_0 = arith.constant 0 : i32
    %c0_i32_1 = arith.constant 0 : i32
    return %c0_i32, %c0_i32_0 : i32, i32
  }
  func.func @transform_4(%arg0: i32) -> (i32, i32) {
    %c0_i32 = arith.constant 0 : i32
    %c0_i32_0 = arith.constant 0 : i32
    return %arg0, %c0_i32 : i32, i32
  }
}

</mosaic_0001>

<bundles_post_ra>
// kernel: tpu_custom_call.1
= control target key start
LH: loop header
LB: loop body
LE: loop exit
PB: predicated region body
PF: predicated region fallthrough
CT: control target
= control target key end

     0   :  { %9 = vsyncpa [#allocation3], 0  ;;  %s470_s0 = inlined_call_operand.hbm [shape: f32[2,8,32], index: 0, kind: input, shape index: {}]   ;;  %s471_s1 = inlined_call_operand.hbm [shape: f32[32,32], index: 1, kind: input, shape index: {}]   ;;  %s472_s2 = inlined_call_operand.vmem [shape: f32[1,32], index: 2, kind: input, shape index: {}]   ;;  %s473_s3 = inlined_call_operand.vmem [shape: f32[1,32], index: 3, kind: input, shape index: {}]   ;;  %s474_s4 = inlined_call_operand.hbm [shape: f32[2,32], index: 4, kind: output, shape index: {}]  }
   0x1   :  { %10 = vsyncpa [#allocation6], 0 }
   0x2   :  { %11 = vsyncpa [#allocation4], 0  ;;  %s382_s15 = smov [#allocation2]   ;;  %s310_s19 = scalar_lea.hbm %s470_s0, 256 }
   0x3   :  { %s17_s16 = sshll.u32 %s382_s15, 4  ;;  %p311_p0 = scmp.ne.s32.totalorder %s470_s0, %s310_s19  ;;  %s18_s16 = int_to_ptr.vmem [resolvable:$true] %s17_s16 }
   0x4   :  { %p314_p1 = scmp.lt.u32.totalorder %s310_s19, %s470_s0 }
   0x6   :  { %p316_p2 = pnand %p314_p1, %p311_p0 }
   0x8   :  { %319 = shalt.err (!%p316_p2)
}
   0x9   :  { %s320_s24 = scalar_lea.vmem %s18_s16, 256  ;;  %p325_p4 = scmp.lt.s32.totalorder %s18_s16, %s18_s16 }
   0xa   :  { %p321_p3 = scmp.ne.s32.totalorder %s18_s16, %s320_s24  ;;  %p326_p5 = scmp.lt.s32.totalorder %s320_s24, %s320_s24 }
   0xc   :  { %p327_p6 = por %p326_p5, %p325_p4 }
   0xe   :  { %p328_p7 = pnand %p327_p6, %p321_p3 }
  0x10   :  { %331 = shalt.err (!%p328_p7)
}
  0x11   :  { %s383_s25 = smov 128   ;;  %s384_s26 = smov 8  }
  0x12   :  { %23 = dma.hbm_to_vmem [thread:$0]  %s470_s0, 256, %s18_s16, [#allocation3], %s383_s25, %s383_s25, %s384_s26  }
  0x13   :  { %s385_s29 = smov [#allocation5]   ;;  %s332_s7 = scalar_lea.hbm %s471_s1, 512 }
  0x14   :  { %s29_s30 = sshll.u32 %s385_s29, 4  ;;  %p333_p8 = scmp.ne.s32.totalorder %s471_s1, %s332_s7  ;;  %s30_s30 = int_to_ptr.vmem [resolvable:$true] %s29_s30 }
  0x15   :  { %p336_p9 = scmp.lt.u32.totalorder %s332_s7, %s471_s1 }
  0x17   :  { %p338_p10 = pnand %p336_p9, %p333_p8 }
  0x19   :  { %341 = shalt.err (!%p338_p10)
}
  0x1a   :  { %s342_s12 = scalar_lea.vmem %s30_s30, 512  ;;  %p347_p12 = scmp.lt.s32.totalorder %s30_s30, %s30_s30 }
  0x1b   :  { %p343_p11 = scmp.ne.s32.totalorder %s30_s30, %s342_s12  ;;  %p348_p13 = scmp.lt.s32.totalorder %s342_s12, %s342_s12 }
  0x1d   :  { %p349_p0 = por %p348_p13, %p347_p12 }
  0x1f   :  { %p350_p1 = pnand %p349_p0, %p343_p11 }
  0x21   :  { %353 = shalt.err (!%p350_p1)
}
  0x22   :  { %35 = dma.hbm_to_vmem [thread:$0]  %s471_s1, 512, %s30_s30, [#allocation6], %s383_s25, %s383_s25, %s384_s26  }
  0x23   :  { %376 = dma.done.wait [#allocation3], 256  }
  0x24   :  { %377 = vsyncadd [#allocation3], 4294967040 }
  0x25   :  { %378 = dma.done.wait [#allocation6], 512  }
  0x26   :  { %379 = vsyncadd [#allocation6], 4294966784  ;;  %vm59_vm0 = vcmask 261120   ;;  %v48_v0 = vld [vmem:[#allocation5] sm:$0xff]  ;;  %v49_v1 = vld [vmem:[#allocation5 + $0x8] sm:$0xff]  ;;  %v160_v20 = vlaneseq  ;;  %vm170_vm1 = vcmask 1041409  }
  0x27   :  { %v50_v2 = vld [vmem:[#allocation5 + $0x10] sm:$0xff]  ;;  %v284_v3 = vpack.c.bf16 %v49_v1, %v48_v0  ;;  %v51_v4 = vld [vmem:[#allocation5 + $0x18] sm:$0xff]  ;;  %vm173_vm2 = vcmask 58368   ;;  %v386_v30 = vmov 0   ;;  %vm245_vm3 = vcmask 254976  }
  0x28   :  { %v437_v5 = vld [vmem:[#allocation2] sm:$0xff]  ;;  %v288_v6 = vpack.c.bf16 %v51_v4, %v50_v2  ;;  %v47_v7 = vld [vmem:[#allocation2 + $0x8] sm:$0xff]  ;;  %v161_v21 = vand.u32 127, %v160_v20  ;;  %v163_v22 = vshrl.u32 %v160_v20, 7  ;;  %299 = vset.pattern.permute.xlu0 %v386_v30  ;;  %298 = vset.pattern.permute.xlu1 %v386_v30 }
  0x29   :  { %281 = vmatprep.mubr.msk.f32.mxu0 %vm59_vm0, %v437_v5  ;;  %285 = vmatprep.subr.bf16.mxu0 %v284_v3  ;;  %v263_v8 = vld [vmem:[%s472_s2] ss:$0 sm:$0xff]  ;;  %s387_s2 = smov [#allocation7]  }
  0x2a   :  { %287 = vmatpush3.bf16.msra.mxu0 %v284_v3  ;;  %v266_v13 = vld [vmem:[%s473_s3] ss:$0 sm:$0xff]  ;;  %v164_v24 = vsub.s32 %v161_v21, %v163_v22  ;;  %v180_v31 = vsub.s32 0, %v163_v22  ;;  %v184_v32 = vsub.s32 1, %v163_v22  ;;  %s253_s3 = sshll.u32 %s387_s2, 4  ;;  %s254_s3 = int_to_ptr.vmem [resolvable:$true] %s253_s3 }
  0x2b   :  { %289 = vmatprep.subr.bf16.mxu0 %v288_v6  ;;  %s354_s17 = scalar_lea.vmem %s254_s3, 32  ;;  %p359_p3 = scmp.lt.s32.totalorder %s254_s3, %s254_s3 }
  0x2c   :  { %p355_p2 = scmp.ne.s32.totalorder %s254_s3, %s354_s17  ;;  %p360_p4 = scmp.lt.s32.totalorder %s354_s17, %s354_s17 }
  0x2e   :  { %291 = vmatpush3.bf16.msra.mxu0 %v288_v6  ;;  %p361_p5 = por %p360_p4, %p359_p3 }
  0x30   :  { %p362_p6 = pnand %p361_p5, %p355_p2 }
  0x31   :  { %282 = vmatmul.mubr.msk.f32.vlgmr.msra.gmra.mrb[0].mxu0 %vm59_vm0, %v47_v7 }
 0x104   :  { %v283_v9 = vpop.f32.mrb[0].mxu0 }
 0x105   :  { %v138_v10 = vadd.f32 %v283_v9, %v263_v8  ;;  %v132_v11 = vpop.f32.mrb[1].mxu0 }
 0x106   :  { %v133_v12 = vadd.f32 %v263_v8, %v132_v11 }
 0x107   :  { %300 = vtanh.f32 %v138_v10 }
 0x108   :  { %302 = vtanh.f32 %v133_v12 }
 0x111   :  { %v301_v14 = vpop.eup %300 }
 0x112   :  { %v303_v15 = vpop.eup %302  ;;  %v151_v18 = vmul.f32 %v301_v14, %v266_v13 }
 0x113   :  { %v150_v16 = vmul.f32 %v303_v15, %v266_v13 }
 0x114   :  { %v155_v19 = vsel %vm59_vm0, %v151_v18, 0.0 }
 0x115   :  { %v152_v17 = vsel %vm59_vm0, %v150_v16, 0.0 }
 0x116   :  { %153 = vadd.xlane.f32.xlu0 %v152_v17 }
 0x11a   :  { %156 = vadd.xlane.f32.xlu0 %v155_v19 }
 0x1a3   :  { %v154_v23 = vpop.xlane.xlu0 %153 }
 0x1a4   :  { %v165_v26 = vrot.slane %v154_v23, %v164_v24 }
 0x1a7   :  { %v157_v25 = vpop.xlane.xlu0 %156 }
 0x1a8   :  { %v169_v27 = vrot.slane %v157_v25, %v164_v24 }
 0x1aa   :  { %v171_v28 = vsel %vm170_vm1, %v169_v27, %v165_v26 }
 0x1ab   :  { %v174_v29 = vsel %vm173_vm2, %v171_v28, -inf }
 0x1ac   :  { %175 = vmax.xlane.f32.xlu1 %v174_v29 }
 0x239   :  { %v176_v33 = vpop.xlane.xlu1 %175 }
 0x23a   :  { %v181_v34 = vrot.slane %v176_v33, %v180_v31  ;;  %v185_v35 = vrot.slane %v176_v33, %v184_v32 }
 0x23c   :  { %v188_v36 = vsub.f32 %v154_v23, %v181_v34  ;;  %v189_v37 = vsub.f32 %v157_v25, %v185_v35 }
 0x23e   :  { %v190_v38 = vmul.f32 1.442695, %v188_v36  ;;  %v192_v39 = vmul.f32 1.442695, %v189_v37 }
 0x240   :  { %304 = vpow2.f32 %v190_v38 }
 0x241   :  { %306 = vpow2.f32 %v192_v39 }
 0x24a   :  { %v305_v40 = vpop.eup %304 }
 0x24b   :  { %v307_v41 = vpop.eup %306  ;;  %197 = vperm.xlu1 %298, %v305_v40  }
 0x24c   :  { %200 = vperm.xlu0 %299, %v307_v41  }
 0x2ca   :  { %v198_v42 = vpop.permute.xlu1 %197 }
 0x2cb   :  { %v201_v43 = vpop.permute.xlu0 %200  ;;  %v205_v44 = vrot.slane %v198_v42, %v164_v24  ;;  %v218_v49 = vmul.f32 %v198_v42, %v437_v5 }
 0x2cc   :  { %v209_v45 = vrot.slane %v201_v43, %v164_v24  ;;  %v219_v48 = vmul.f32 %v201_v43, %v47_v7 }
 0x2cd   :  { %v220_v51 = vsel %vm59_vm0, %v218_v49, 0.0 }
 0x2ce   :  { %v210_v46 = vsel %vm170_vm1, %v209_v45, %v205_v44  ;;  %v227_v50 = vsel %vm59_vm0, %v219_v48, 0.0  ;;  %v221_v53 = vrot.slane %v220_v51, 4 }
 0x2cf   :  { %v212_v47 = vsel %vm173_vm2, %v210_v46, 0.0  ;;  %v228_v52 = vrot.slane %v227_v50, 4 }
 0x2d0   :  { %213 = vadd.xlane.f32.xlu1 %v212_v47  ;;  %v222_v55 = vadd.f32 %v221_v53, %v220_v51 }
 0x2d1   :  { %v229_v54 = vadd.f32 %v228_v52, %v227_v50 }
 0x2d2   :  { %v223_v58 = vrot.slane %v222_v55, 2 }
 0x2d3   :  { %v230_v56 = vrot.slane %v229_v54, 2 }
 0x2d4   :  { %v224_v60 = vadd.f32 %v223_v58, %v222_v55 }
 0x2d5   :  { %v231_v59 = vadd.f32 %v230_v56, %v229_v54 }
 0x2d6   :  { %v225_v62 = vrot.slane %v224_v60, 1 }
 0x2d7   :  { %v232_v61 = vrot.slane %v231_v59, 1 }
 0x2d8   :  { %v226_v2 = vadd.f32 %v225_v62, %v224_v60 }
 0x2d9   :  { %v233_v0 = vadd.f32 %v232_v61, %v231_v59 }
 0x35d   :  { %v214_v57 = vpop.xlane.xlu1 %213 }
 0x35e   :  { %308 = vrcp.f32 %v214_v57 }
 0x368   :  { %v309_v63 = vpop.eup %308 }
 0x369   :  { %v235_v1 = vrot.slane %v309_v63, 1  ;;  %v238_v4 = vmul.f32 %v309_v63, %v226_v2 }
 0x36b   :  { %v239_v3 = vmul.f32 %v235_v1, %v233_v0 }
 0x36d   :  { %v242_v5 = vrot.slane %v239_v3, 7 }
 0x36f   :  { %v243_v6 = vsel %vm170_vm1, %v242_v5, %v238_v4 }
 0x370   :  { %246 = vst.msk [vmem:[#allocation7] sm:$0x3] %vm245_vm3, %v243_v6 }
 0x371   :  { %365 = shalt.err (!%p362_p6)
}
 0x372   :  { %s366_s20 = scalar_lea.hbm %s474_s4, 32 }
 0x373   :  { %p367_p7 = scmp.ne.s32.totalorder %s474_s4, %s366_s20  ;;  %p370_p8 = scmp.lt.u32.totalorder %s366_s20, %s474_s4 }
 0x375   :  { %p372_p9 = pnand %p370_p8, %p367_p7 }
 0x377   :  { %375 = shalt.err (!%p372_p9)
}
 0x378   :  { %256 = dma.vmem_to_hbm [thread:$0]  %s254_s3, 32, %s474_s4, [#allocation4]  }
 0x379   :  { %380 = dma.done.wait [#allocation4], 32  }
 0x37a   :  { %381 = vsyncadd [#allocation4], 4294967264 }
 0x37b   :  { %260 = vsyncpa [#allocation3], 1 }
 0x37c   :  { %261 = vsyncpa [#allocation6], 1 }
 0x37d   :  { %262 = vsyncpa [#allocation4], 1 }

</bundles_post_ra>
